<compile_context>
chip_gen: v7x
topology: tpu7x:2x2x1
jax: 0.10.0
libtpu: 0.0.40
codegen_flags: <defaults>
</compile_context>

<pallas_src>
import jax
import jax.numpy as jnp
from jax.experimental import pallas as pl
from jax.experimental.pallas import tpu as pltpu


def _attention_kernel(q_ref, c_ref, m_ref, w_in_t_ref, w1_t_ref, w2_t_ref, o_ref):
    BB, Lq, D = q_ref.shape
    Lk = c_ref.shape[1]

    q = q_ref[...]                                    # (BB, Lq, D)
    c = c_ref[...]                                    # (BB, Lk, D)
    m = m_ref[...].astype(jnp.float32)                # (BB, Lq, Lk), 0/1

    w_in_t = w_in_t_ref[...]                          # (D, D) = W_in^T
    w1_t = w1_t_ref[...]                              # (D, D) = W_out[:, :D]^T (acts on mix)
    w2_t = w2_t_ref[...]                              # (D, D) = W_out[:, D:]^T (acts on query')

    # linear_in on the flattened (BB*Lq, D) slab: query' = query @ W_in^T
    q2 = q.reshape(BB * Lq, D)
    qp2 = jnp.dot(q2, w_in_t, preferred_element_type=jnp.float32)     # (BB*Lq, D)
    qp = qp2.reshape(BB, Lq, D)

    # scores[b] = query'[b] @ context[b]^T  (batched contraction, no in-kernel transpose)
    scores = jnp.einsum('bqd,bkd->bqk', qp, c,
                        preferred_element_type=jnp.float32)            # (BB, Lq, Lk)

    # masked_softmax (reference semantics, fused single normalization):
    #   softmax(scores*m)*m / (sum(.)+1e-13) == e*m / (sum(e*m) + 1e-13*sum(e))
    v = scores * m
    v_max = jnp.max(v, axis=-1, keepdims=True)
    e = jnp.exp(v - v_max)
    em = e * m
    denom = jnp.sum(em, axis=-1, keepdims=True) \
        + 1e-13 * jnp.sum(e, axis=-1, keepdims=True)
    weights = em * pl.reciprocal(denom, approx=False)                  # (BB, Lq, Lk)

    # mix[b] = weights[b] @ context[b]
    mix = jnp.einsum('bqk,bkd->bqd', weights, c,
                     preferred_element_type=jnp.float32)               # (BB, Lq, D)

    # linear_out(cat([mix, query'], -1)) == mix @ W1^T + query' @ W2^T, then tanh.
    out2 = jnp.dot(mix.reshape(BB * Lq, D), w1_t,
                   preferred_element_type=jnp.float32) \
        + jnp.dot(qp2, w2_t, preferred_element_type=jnp.float32)       # (BB*Lq, D)

    # TODO(synk): D (=32 here) < 128 lanes -> masked stores; for very long Lq/Lk this
    # kernel should also tile Lk with an online-softmax accumulator (mandatory on
    # v7x's 64 MiB VMEM) and optionally pack the output lane-dense in the wrapper.
    o_ref[...] = jnp.tanh(out2).reshape(BB, Lq, D).astype(o_ref.dtype)


def _pick_batch_block(B, Lq, Lk, D, budget_bytes=4 << 20):
    """Largest divisor of B whose per-step f32 working set stays within a small budget."""
    per_batch = (Lq * D + Lk * D + Lq * Lk + Lq * D) * 4
    bb = 1
    for cand in range(1, B + 1):
        if B % cand == 0 and cand * per_batch <= budget_bytes and cand * Lq <= 2048:
            bb = cand
    return bb


def attention_forward(query, context, mask, w_in, w_out, *, batch_block=None):
    """query: (B, Lq, D), context: (B, Lk, D), mask: (B*Lq, Lk) or (B, Lq, Lk),
    w_in: (D, D), w_out: (D, 2D) (PyTorch nn.Linear layouts). Returns (B, Lq, D)."""
    B, Lq, D = query.shape
    Lk = context.shape[1]

    if batch_block is None:
        batch_block = _pick_batch_block(B, Lq, Lk, D)
    assert B % batch_block == 0, "batch_block must divide B"
    BB = batch_block

    # Host-side one-time weight prep: pre-transpose so the kernel never transposes.
    w_in_t = jnp.asarray(w_in).T          # (D, D): q  @ w_in_t == q @ W_in^T
    w1_t = jnp.asarray(w_out)[:, :D].T    # (D, D): mix @ w1_t
    w2_t = jnp.asarray(w_out)[:, D:].T    # (D, D): q'  @ w2_t

    # int8 mask: 4x less HBM traffic than f32.
    mask_i8 = mask.reshape(B, Lq, Lk).astype(jnp.int8)

    return pl.pallas_call(
        _attention_kernel,
        out_shape=jax.ShapeDtypeStruct((B, Lq, D), query.dtype),
        grid_spec=pltpu.PrefetchScalarGridSpec(
            num_scalar_prefetch=0,
            grid=(B // BB,),
            in_specs=[
                pl.BlockSpec((BB, Lq, D), lambda b: (b, 0, 0)),
                pl.BlockSpec((BB, Lk, D), lambda b: (b, 0, 0)),
                pl.BlockSpec((BB, Lq, Lk), lambda b: (b, 0, 0)),
                pl.BlockSpec((D, D), lambda b: (0, 0)),
                pl.BlockSpec((D, D), lambda b: (0, 0)),
                pl.BlockSpec((D, D), lambda b: (0, 0)),
            ],
            out_specs=pl.BlockSpec((BB, Lq, D), lambda b: (b, 0, 0)),
        ),
        compiler_params=pltpu.CompilerParams(
            dimension_semantics=("parallel",)),
    )(query, context, mask_i8, w_in_t, w1_t, w2_t)


def attention_reference(query, context, mask, w_in, w_out):
    """Pure-JAX reference mirroring the PyTorch forward exactly (two-step masked softmax)."""
    B, Lq, D = query.shape
    Lk = context.shape[1]
    qp = jnp.einsum("bld,ed->ble", query, w_in)
    scores = jnp.einsum("bld,bkd->blk", qp, context)
    m = mask.reshape(B, Lq, Lk).astype(jnp.float32)
    v = scores * m
    sm = jax.nn.softmax(v, axis=-1)
    r = sm * m
    weights = r / (jnp.sum(r, axis=-1, keepdims=True) + 1e-13)
    mix = jnp.einsum("blk,bkd->bld", weights, context)
    combined = jnp.concatenate([mix, qp], axis=-1)
    out = jnp.einsum("blc,dc->bld", combined, w_out)
    return jnp.tanh(out)


if __name__ == "__main__":
    B, Lq, Lk, D = 2, 8, 8, 32

    key = jax.random.PRNGKey(0)
    k_q, k_c, k_m, k_win, k_wout = jax.random.split(key, 5)

    query = jax.random.normal(k_q, (B, Lq, D), dtype=jnp.float32)
    context = jax.random.normal(k_c, (B, Lk, D), dtype=jnp.float32)
    # 0/1 float mask, same shape masked_softmax receives in the reference ([B*Lq, Lk]).
    mask = (jax.random.uniform(k_m, (B * Lq, Lk)) > 0.3).astype(jnp.float32)
    # Make sure every row has at least one unmasked element (avoid all-zero rows).
    mask = mask.at[:, 0].set(1.0)

    # Deterministic parameter init (shapes per nn.Linear: weight is (out, in)).
    w_in = jax.random.normal(k_win, (D, D), dtype=jnp.float32) * (1.0 / jnp.sqrt(D))
    w_out = jax.random.normal(k_wout, (D, 2 * D), dtype=jnp.float32) * (1.0 / jnp.sqrt(2 * D))

    out = attention_forward(query, context, mask, w_in, w_out)
    out = jax.block_until_ready(out)

    ref = attention_reference(query, context, mask, w_in, w_out)
    assert out.shape == (B, Lq, D)
    assert jnp.allclose(out, ref, atol=1e-4, rtol=1e-4), "mismatch vs reference"

    print("KERNEL_OK")
</pallas_src>

<mosaic_0001>
module attributes {stable_mosaic.version = 11 : i64} {
  func.func @_attention_kernel(%arg0: i32, %arg1: memref<2x8x32xf32, #tpu.memory_space<vmem>>, %arg2: memref<2x8x32xf32, #tpu.memory_space<vmem>>, %arg3: memref<2x8x8xi8, #tpu.memory_space<vmem>>, %arg4: memref<32x32xf32, #tpu.memory_space<vmem>>, %arg5: memref<32x32xf32, #tpu.memory_space<vmem>>, %arg6: memref<32x32xf32, #tpu.memory_space<vmem>>, %arg7: memref<2x8x32xf32, #tpu.memory_space<vmem>>) attributes {dimension_semantics = [#tpu.dimension_semantics<parallel>], iteration_bounds = array<i64: 1>, scalar_prefetch = 0 : i64, scratch_operands = 0 : i64, tpu.core_type = #tpu.core_type<tc>, window_params = [{transform_indices = @transform_0, window_bounds = array<i64: 2, 8, 32>}, {transform_indices = @transform_1, window_bounds = array<i64: 2, 8, 32>}, {transform_indices = @transform_2, window_bounds = array<i64: 2, 8, 8>}, {pipeline_mode = #tpu.pipeline_mode<synchronous>, transform_indices = @transform_3, window_bounds = array<i64: 32, 32>}, {pipeline_mode = #tpu.pipeline_mode<synchronous>, transform_indices = @transform_4, window_bounds = array<i64: 32, 32>}, {pipeline_mode = #tpu.pipeline_mode<synchronous>, transform_indices = @transform_5, window_bounds = array<i64: 32, 32>}, {transform_indices = @transform_6, window_bounds = array<i64: 2, 8, 32>}]} {
    %c0 = arith.constant 0 : index
    %c0_0 = arith.constant 0 : index
    %c0_1 = arith.constant 0 : index
    %0 = vector.load %arg1[%c0, %c0_0, %c0_1] : memref<2x8x32xf32, #tpu.memory_space<vmem>>, vector<2x8x32xf32>
    %c0_2 = arith.constant 0 : index
    %c0_3 = arith.constant 0 : index
    %c0_4 = arith.constant 0 : index
    %1 = vector.load %arg2[%c0_2, %c0_3, %c0_4] : memref<2x8x32xf32, #tpu.memory_space<vmem>>, vector<2x8x32xf32>
    %c0_5 = arith.constant 0 : index
    %c0_6 = arith.constant 0 : index
    %c0_7 = arith.constant 0 : index
    %2 = vector.load %arg3[%c0_5, %c0_6, %c0_7] : memref<2x8x8xi8, #tpu.memory_space<vmem>>, vector<2x8x8xi8>
    %3 = arith.sitofp %2 : vector<2x8x8xi8> to vector<2x8x8xf32>
    %c0_8 = arith.constant 0 : index
    %c0_9 = arith.constant 0 : index
    %4 = vector.load %arg4[%c0_8, %c0_9] : memref<32x32xf32, #tpu.memory_space<vmem>>, vector<32x32xf32>
    %c0_10 = arith.constant 0 : index
    %c0_11 = arith.constant 0 : index
    %5 = vector.load %arg5[%c0_10, %c0_11] : memref<32x32xf32, #tpu.memory_space<vmem>>, vector<32x32xf32>
    %c0_12 = arith.constant 0 : index
    %c0_13 = arith.constant 0 : index
    %6 = vector.load %arg6[%c0_12, %c0_13] : memref<32x32xf32, #tpu.memory_space<vmem>>, vector<32x32xf32>
    %7 = vector.shape_cast %0 : vector<2x8x32xf32> to vector<16x32xf32>
    %cst = arith.constant dense<0.000000e+00> : vector<16x32xf32>
    %8 = tpu.matmul %7, %4, %cst {dimension_numbers = #tpu.dot_dimension_numbers<[1], [0], [0], [1], [0, 0, 1, 1], [], []>} : vector<16x32xf32>, vector<32x32xf32>, vector<16x32xf32> -> vector<16x32xf32>
    %9 = vector.shape_cast %8 : vector<16x32xf32> to vector<2x8x32xf32>
    "tpu.trace_start"() <{level = 10 : i32, message = "bqd,bkd->bqk"}> : () -> ()
    %cst_14 = arith.constant dense<0.000000e+00> : vector<2x8x8xf32>
    %10 = tpu.matmul %9, %1, %cst_14 {dimension_numbers = #tpu.dot_dimension_numbers<[2], [2], [1], [1], [0, 0, 0, 1, 1, 1], [0], [0]>} : vector<2x8x32xf32>, vector<2x8x32xf32>, vector<2x8x8xf32> -> vector<2x8x8xf32>
    "tpu.trace_stop"() : () -> ()
    %11 = arith.mulf %10, %3 : vector<2x8x8xf32>
    %cst_15 = arith.constant dense<0xFF800000> : vector<2x8xf32>
    %12 = vector.multi_reduction <maximumf>, %11, %cst_15 [2] : vector<2x8x8xf32> to vector<2x8xf32>
    %13 = vector.shape_cast %12 : vector<2x8xf32> to vector<2x8x1xf32>
    %14 = vector.broadcast %13 : vector<2x8x1xf32> to vector<2x8x8xf32>
    %15 = arith.subf %11, %14 : vector<2x8x8xf32>
    %16 = math.exp %15 : vector<2x8x8xf32>
    %17 = arith.mulf %16, %3 : vector<2x8x8xf32>
    %cst_16 = arith.constant dense<0.000000e+00> : vector<2x8xf32>
    %18 = vector.multi_reduction <add>, %17, %cst_16 [2] : vector<2x8x8xf32> to vector<2x8xf32>
    %19 = vector.shape_cast %18 : vector<2x8xf32> to vector<2x8x1xf32>
    %cst_17 = arith.constant dense<0.000000e+00> : vector<2x8xf32>
    %20 = vector.multi_reduction <add>, %16, %cst_17 [2] : vector<2x8x8xf32> to vector<2x8xf32>
    %21 = vector.shape_cast %20 : vector<2x8xf32> to vector<2x8x1xf32>
    %cst_18 = arith.constant 9.99999982E-14 : f32
    %22 = vector.broadcast %cst_18 : f32 to vector<2x8x1xf32>
    %23 = arith.mulf %22, %21 : vector<2x8x1xf32>
    %24 = arith.addf %19, %23 : vector<2x8x1xf32>
    %25 = tpu.reciprocal %24 : vector<2x8x1xf32> -> vector<2x8x1xf32>
    %26 = vector.broadcast %25 : vector<2x8x1xf32> to vector<2x8x8xf32>
    %27 = arith.mulf %17, %26 : vector<2x8x8xf32>
    "tpu.trace_start"() <{level = 10 : i32, message = "bqk,bkd->bqd"}> : () -> ()
    %cst_19 = arith.constant dense<0.000000e+00> : vector<2x8x32xf32>
    %28 = tpu.matmul %27, %1, %cst_19 {dimension_numbers = #tpu.dot_dimension_numbers<[2], [1], [1], [2], [0, 0, 0, 1, 1, 2], [0], [0]>} : vector<2x8x8xf32>, vector<2x8x32xf32>, vector<2x8x32xf32> -> vector<2x8x32xf32>
    "tpu.trace_stop"() : () -> ()
    %29 = vector.shape_cast %28 : vector<2x8x32xf32> to vector<16x32xf32>
    %cst_20 = arith.constant dense<0.000000e+00> : vector<16x32xf32>
    %30 = tpu.matmul %29, %5, %cst_20 {dimension_numbers = #tpu.dot_dimension_numbers<[1], [0], [0], [1], [0, 0, 1, 1], [], []>} : vector<16x32xf32>, vector<32x32xf32>, vector<16x32xf32> -> vector<16x32xf32>
    %cst_21 = arith.constant dense<0.000000e+00> : vector<16x32xf32>
    %31 = tpu.matmul %8, %6, %cst_21 {dimension_numbers = #tpu.dot_dimension_numbers<[1], [0], [0], [1], [0, 0, 1, 1], [], []>} : vector<16x32xf32>, vector<32x32xf32>, vector<16x32xf32> -> vector<16x32xf32>
    %32 = arith.addf %30, %31 : vector<16x32xf32>
    %33 = math.tanh %32 : vector<16x32xf32>
    %34 = vector.shape_cast %33 : vector<16x32xf32> to vector<2x8x32xf32>
    %c0_22 = arith.constant 0 : index
    %c0_23 = arith.constant 0 : index
    %c0_24 = arith.constant 0 : index
    %35 = vector.load %arg7[%c0_22, %c0_23, %c0_24] : memref<2x8x32xf32, #tpu.memory_space<vmem>>, vector<2x8x32xf32>
    tpu.vector_store %arg7[%c0_22, %c0_23, %c0_24], %34 {strides = array<i32>} : memref<2x8x32xf32, #tpu.memory_space<vmem>>, vector<2x8x32xf32>,
    return
  }
  func.func @transform_0(%arg0: i32) -> (i32, i32, i32) {
    %c0_i32 = arith.constant 0 : i32
    %c0_i32_0 = arith.constant 0 : i32
    %c0_i32_1 = arith.constant 0 : i32
    return %arg0, %c0_i32, %c0_i32_0 : i32, i32, i32
  }
  func.func @transform_1(%arg0: i32) -> (i32, i32, i32) {
    %c0_i32 = arith.constant 0 : i32
    %c0_i32_0 = arith.constant 0 : i32
    %c0_i32_1 = arith.constant 0 : i32
    return %arg0, %c0_i32, %c0_i32_0 : i32, i32, i32
  }
  func.func @transform_2(%arg0: i32) -> (i32, i32, i32) {
    %c0_i32 = arith.constant 0 : i32
    %c0_i32_0 = arith.constant 0 : i32
    %c0_i32_1 = arith.constant 0 : i32
    return %arg0, %c0_i32, %c0_i32_0 : i32, i32, i32
  }
  func.func @transform_3(%arg0: i32) -> (i32, i32) {
    %c0_i32 = arith.constant 0 : i32
    %c0_i32_0 = arith.constant 0 : i32
    %c0_i32_1 = arith.constant 0 : i32
    return %c0_i32, %c0_i32_0 : i32, i32
  }
  func.func @transform_4(%arg0: i32) -> (i32, i32) {
    %c0_i32 = arith.constant 0 : i32
    %c0_i32_0 = arith.constant 0 : i32
    %c0_i32_1 = arith.constant 0 : i32
    return %c0_i32, %c0_i32_0 : i32, i32
  }
  func.func @transform_5(%arg0: i32) -> (i32, i32) {
    %c0_i32 = arith.constant 0 : i32
    %c0_i32_0 = arith.constant 0 : i32
    %c0_i32_1 = arith.constant 0 : i32
    return %c0_i32, %c0_i32_0 : i32, i32
  }
  func.func @transform_6(%arg0: i32) -> (i32, i32, i32) {
    %c0_i32 = arith.constant 0 : i32
    %c0_i32_0 = arith.constant 0 : i32
    %c0_i32_1 = arith.constant 0 : i32
    return %arg0, %c0_i32, %c0_i32_0 : i32, i32, i32
  }
}

</mosaic_0001>

<bundles_post_ra>
// kernel: tpu_custom_call.1
= control target key start
LH: loop header
LB: loop body
LE: loop exit
PB: predicated region body
PF: predicated region fallthrough
CT: control target
= control target key end

     0   :  { %11 = vsyncpa [#allocation3], 0  ;;  %s1173_s0 = inlined_call_operand.hbm [shape: f32[2,8,32], index: 0, kind: input, shape index: {}]   ;;  %s1174_s1 = inlined_call_operand.hbm [shape: f32[2,8,32], index: 1, kind: input, shape index: {}]   ;;  %s1175_s2 = inlined_call_operand.vmem [shape: s8[2,8,8], index: 2, kind: input, shape index: {}]   ;;  %s1176_s3 = inlined_call_operand.hbm [shape: f32[32,32], index: 3, kind: input, shape index: {}]   ;;  %s1177_s4 = inlined_call_operand.hbm [shape: f32[32,32], index: 4, kind: input, shape index: {}]   ;;  %s1178_s5 = inlined_call_operand.hbm [shape: f32[32,32], index: 5, kind: input, shape index: {}]   ;;  %s1179_s6 = inlined_call_operand.hbm [shape: f32[2,8,32], index: 6, kind: output, shape index: {}]  }
   0x1   :  { %12 = vsyncpa [#allocation6], 0 }
   0x2   :  { %13 = vsyncpa [#allocation9], 0 }
   0x3   :  { %14 = vsyncpa [#allocation4], 0  ;;  %s993_s21 = smov [#allocation5]   ;;  %s994_s23 = smov [#allocation8]  }
   0x4   :  { %s32_s22 = sshll.u32 %s993_s21, 4  ;;  %s58_s24 = sshll.u32 %s994_s23, 4  ;;  %s33_s22 = int_to_ptr.vmem [resolvable:$true] %s32_s22  ;;  %s1038_s24 = int_to_ptr.vmem [resolvable:$true] %s58_s24 }
   0x5   :  { %s853_s27 = scalar_lea.hbm %s1174_s1, 256 }
   0x6   :  { %p854_p0 = scmp.ne.s32.totalorder %s1174_s1, %s853_s27  ;;  %p857_p1 = scmp.lt.u32.totalorder %s853_s27, %s1174_s1 }
   0x8   :  { %p859_p2 = pnand %p857_p1, %p854_p0 }
   0xa   :  { %862 = shalt.err (!%p859_p2)
}
   0xb   :  { %s863_s8 = scalar_lea.vmem %s33_s22, 256  ;;  %p868_p4 = scmp.lt.s32.totalorder %s33_s22, %s33_s22 }
   0xc   :  { %p864_p3 = scmp.ne.s32.totalorder %s33_s22, %s863_s8  ;;  %p869_p5 = scmp.lt.s32.totalorder %s863_s8, %s863_s8 }
   0xe   :  { %p870_p6 = por %p869_p5, %p868_p4 }
  0x10   :  { %p871_p7 = pnand %p870_p6, %p864_p3 }
  0x12   :  { %874 = shalt.err (!%p871_p7)
}
  0x13   :  { %s995_s9 = smov 128   ;;  %s996_s10 = smov 8  }
  0x14   :  { %38 = dma.hbm_to_vmem [thread:$0]  %s1174_s1, 256, %s33_s22, [#allocation6], %s995_s9, %s995_s9, %s996_s10  }
  0x15   :  { %s875_s15 = scalar_lea.hbm %s1177_s4, 512 }
  0x16   :  { %p876_p8 = scmp.ne.s32.totalorder %s1177_s4, %s875_s15  ;;  %p879_p9 = scmp.lt.u32.totalorder %s875_s15, %s1177_s4 }
  0x18   :  { %p881_p10 = pnand %p879_p9, %p876_p8 }
  0x1a   :  { %884 = shalt.err (!%p881_p10)
}
  0x1b   :  { %s885_s20 = scalar_lea.vmem %s1038_s24, 512  ;;  %p890_p12 = scmp.lt.s32.totalorder %s1038_s24, %s1038_s24 }
  0x1c   :  { %p886_p11 = scmp.ne.s32.totalorder %s1038_s24, %s885_s20  ;;  %p891_p13 = scmp.lt.s32.totalorder %s885_s20, %s885_s20 }
  0x1e   :  { %p892_p0 = por %p891_p13, %p890_p12 }
  0x20   :  { %p893_p1 = pnand %p892_p0, %p886_p11 }
  0x22   :  { %896 = shalt.err (!%p893_p1)
}
  0x23   :  { %64 = dma.hbm_to_vmem [thread:$0]  %s1177_s4, 512, %s1038_s24, [#allocation9], %s995_s9, %s995_s9, %s996_s10  }
  0x24   :  { %s997_s22 = smov [#allocation2]   ;;  %s998_s25 = smov [#allocation7]  }
  0x25   :  { %s20_s23 = sshll.u32 %s997_s22, 4  ;;  %s46_s26 = sshll.u32 %s998_s25, 4  ;;  %s21_s23 = int_to_ptr.vmem [resolvable:$true] %s20_s23  ;;  %s1075_s26 = int_to_ptr.vmem [resolvable:$true] %s46_s26 }
  0x26   :  { %s897_s29 = scalar_lea.hbm %s1173_s0, 256 }
  0x27   :  { %p898_p2 = scmp.ne.s32.totalorder %s1173_s0, %s897_s29  ;;  %p901_p3 = scmp.lt.u32.totalorder %s897_s29, %s1173_s0 }
  0x29   :  { %p903_p4 = pnand %p901_p3, %p898_p2 }
  0x2b   :  { %906 = shalt.err (!%p903_p4)
}
  0x2c   :  { %s907_s4 = scalar_lea.vmem %s21_s23, 256  ;;  %p912_p6 = scmp.lt.s32.totalorder %s21_s23, %s21_s23 }
  0x2d   :  { %p908_p5 = scmp.ne.s32.totalorder %s21_s23, %s907_s4  ;;  %p913_p7 = scmp.lt.s32.totalorder %s907_s4, %s907_s4 }
  0x2f   :  { %p914_p8 = por %p913_p7, %p912_p6 }
  0x31   :  { %p915_p9 = pnand %p914_p8, %p908_p5 }
  0x33   :  { %918 = shalt.err (!%p915_p9)
}
  0x34   :  { %26 = dma.hbm_to_vmem [thread:$0]  %s1173_s0, 256, %s21_s23, [#allocation3], %s995_s9, %s995_s9, %s996_s10  }
  0x35   :  { %s919_s15 = scalar_lea.hbm %s1176_s3, 512 }
  0x36   :  { %p920_p10 = scmp.ne.s32.totalorder %s1176_s3, %s919_s15  ;;  %p923_p11 = scmp.lt.u32.totalorder %s919_s15, %s1176_s3 }
  0x38   :  { %p925_p12 = pnand %p923_p11, %p920_p10 }
  0x3a   :  { %928 = shalt.err (!%p925_p12)
}
  0x3b   :  { %s929_s20 = scalar_lea.vmem %s1075_s26, 512  ;;  %p934_p0 = scmp.lt.s32.totalorder %s1075_s26, %s1075_s26 }
  0x3c   :  { %p930_p13 = scmp.ne.s32.totalorder %s1075_s26, %s929_s20  ;;  %p935_p1 = scmp.lt.s32.totalorder %s929_s20, %s929_s20 }
  0x3e   :  { %p936_p2 = por %p935_p1, %p934_p0 }
  0x40   :  { %p937_p3 = pnand %p936_p2, %p930_p13 }
  0x42   :  { %940 = shalt.err (!%p937_p3)
}
  0x43   :  { %52 = dma.hbm_to_vmem [thread:$0]  %s1176_s3, 512, %s1075_s26, [#allocation6], %s995_s9, %s995_s9, %s996_s10  }
  0x44   :  { %s999_s21 = smov [#allocation10]   ;;  %s941_s27 = scalar_lea.hbm %s1178_s5, 512 }
  0x45   :  { %s70_s22 = sshll.u32 %s999_s21, 4  ;;  %p942_p4 = scmp.ne.s32.totalorder %s1178_s5, %s941_s27  ;;  %s71_s22 = int_to_ptr.vmem [resolvable:$true] %s70_s22 }
  0x46   :  { %p945_p5 = scmp.lt.u32.totalorder %s941_s27, %s1178_s5 }
  0x48   :  { %p947_p6 = pnand %p945_p5, %p942_p4 }
  0x4a   :  { %950 = shalt.err (!%p947_p6)
}
  0x4b   :  { %s951_s8 = scalar_lea.vmem %s71_s22, 512  ;;  %p956_p8 = scmp.lt.s32.totalorder %s71_s22, %s71_s22 }
  0x4c   :  { %p952_p7 = scmp.ne.s32.totalorder %s71_s22, %s951_s8  ;;  %p957_p9 = scmp.lt.s32.totalorder %s951_s8, %s951_s8 }
  0x4e   :  { %p958_p10 = por %p957_p9, %p956_p8 }
  0x50   :  { %p959_p11 = pnand %p958_p10, %p952_p7 }
  0x52   :  { %962 = shalt.err (!%p959_p11)
}
  0x53   :  { %76 = dma.hbm_to_vmem [thread:$0]  %s1178_s5, 512, %s71_s22, [#allocation9], %s995_s9, %s995_s9, %s996_s10  }
  0x54   :  { %985 = dma.done.wait [#allocation3], 256  }
  0x55   :  { %986 = vsyncadd [#allocation3], 4294967040 }
  0x56   :  { %987 = dma.done.wait [#allocation6], 768  }
  0x57   :  { %988 = vsyncadd [#allocation6], 4294966528 }
  0x58   :  { %989 = dma.done.wait [#allocation9], 1024  }
  0x59   :  { %990 = vsyncadd [#allocation9], 4294966272  ;;  %v1000_v0 = vmov 0.0   ;;  %vm114_vm0 = vcmask 261120   ;;  %v102_v1 = vld [vmem:[#allocation7] sm:$0xff]  ;;  %v103_v2 = vld [vmem:[#allocation7 + $0x8] sm:$0xff] }
  0x5a   :  { %773 = vmatprep.subr.mxu0 %v1000_v0  ;;  %v104_v3 = vld [vmem:[#allocation7 + $0x10] sm:$0xff]  ;;  %v805_v4 = vpack.c.bf16 %v103_v2, %v102_v1  ;;  %v105_v5 = vld [vmem:[#allocation7 + $0x18] sm:$0xff]  ;;  %v92_v6 = vld [vmem:[#allocation2] sm:$0xff]  ;;  %vm1001_vm1 = vmmov 0   ;;  %vm350_vm2 = vcmask 64512  }
  0x5b   :  { %v809_v7 = vpack.c.bf16 %v105_v5, %v104_v3  ;;  %760 = vmatprep.mubr.msk.f32.mxu1 %vm114_vm0, %v92_v6  ;;  %v94_v8 = vld [vmem:[#allocation5] sm:$0xff]  ;;  %v93_v9 = vld [vmem:[#allocation2 + $0x8] sm:$0xff]  ;;  %775 = vmatprep.mubr.msk.f32.mxu0 %vm1001_vm1, %v1000_v0  ;;  %v95_v11 = vld [vmem:[#allocation5 + $0x8] sm:$0xff] }
  0x5c   :  { %806 = vmatprep.subr.bf16.mxu1 %v805_v4  ;;  %774 = vmatpush3.msra.mxu0 %v94_v8  ;;  %v723_v13 = vld [vmem:[%s1175_s2] sm:$0xf]   ;;  %v111_v41 = vld [vmem:[#allocation10 + $0x8] sm:$0xff]  ;;  %v112_v51 = vld [vmem:[#allocation10 + $0x10] sm:$0xff]  ;;  %s1002_s2 = smov [#allocation11]  }
  0x5d   :  { %808 = vmatpush3.bf16.msra.mxu1 %v805_v4  ;;  %v724_v14 = vunpack.c.0.s8 %v723_v13  ;;  %v725_v16 = vunpack.c.1.s8 %v723_v13  ;;  %v110_v40 = vld [vmem:[#allocation10] sm:$0xff]  ;;  %v113_v52 = vld [vmem:[#allocation10 + $0x18] sm:$0xff]  ;;  %v107_v57 = vld [vmem:[#allocation8 + $0x8] sm:$0xff]  ;;  %s696_s4 = sshll.u32 %s1002_s2, 4  ;;  %s697_s4 = int_to_ptr.vmem [resolvable:$true] %s696_s4 }
  0x5e   :  { %810 = vmatprep.subr.bf16.mxu1 %v809_v7  ;;  %v813_v42 = vpack.c.bf16 %v111_v41, %v110_v40  ;;  %v817_v55 = vpack.c.bf16 %v113_v52, %v112_v51  ;;  %v106_v56 = vld [vmem:[#allocation8] sm:$0xff]  ;;  %v108_v61 = vld [vmem:[#allocation8 + $0x10] sm:$0xff]  ;;  %v109_v62 = vld [vmem:[#allocation8 + $0x18] sm:$0xff]  ;;  %s963_s24 = scalar_lea.vmem %s697_s4, 256  ;;  %p968_p13 = scmp.lt.s32.totalorder %s697_s4, %s697_s4 }
  0x5f   :  { %v100_v15 = vcvt.s32.f32 %v724_v14  ;;  %v101_v20 = vcvt.s32.f32 %v725_v16  ;;  %v821_v58 = vpack.c.bf16 %v107_v57, %v106_v56  ;;  %v825_v63 = vpack.c.bf16 %v109_v62, %v108_v61  ;;  %p964_p12 = scmp.ne.s32.totalorder %s697_s4, %s963_s24  ;;  %p969_p0 = scmp.lt.s32.totalorder %s963_s24, %s963_s24 }
  0x60   :  { %814 = vmatprep.subr.bf16.mxu0 %v813_v42 }
  0x61   :  { %812 = vmatpush3.bf16.msra.mxu1 %v809_v7  ;;  %p970_p1 = por %p969_p0, %p968_p13 }
  0x62   :  { %763 = vmatprep.subr.mxu1 %v1000_v0 }
  0x63   :  { %p971_p2 = pnand %p970_p1, %p964_p12 }
  0x64   :  { %761 = vmatmul.mubr.msk.f32.vlgmr.msra.gmra.mrb[0].mxu1 %vm114_vm0, %v93_v9 }
  0x65   :  { %765 = vmatprep.mubr.msk.f32.mxu1 %vm1001_vm1, %v1000_v0 }
  0x6a   :  { %764 = vmatpush3.xpose.msk.msra.mxu1 %vm114_vm0, %v94_v8 }
  0x6b   :  { %768 = vmatprep.subr.mxu1 %v1000_v0 }
 0x137   :  { %v1130_v10 = vpop.f32.mrb[0].mxu1 }
 0x138   :  { %v1132_v12 = vpop.f32.mrb[1].mxu1 }
 0x139   :  { %766 = vmatmul.mubr.msk.f32.vlgmr.msra.gmra.mrb[2].mxu1 %vm114_vm0, %v1132_v12 }
 0x13a   :  { %769 = vmatpush3.xpose.msk.msra.mxu1 %vm114_vm0, %v95_v11  ;;  %770 = vmatprep.mubr.msk.f32.mxu1 %vm1001_vm1, %v1000_v0 }
 0x13b   :  { %778 = vmatprep.subr.mxu1 %v1000_v0 }
 0x13d   :  { %771 = vmatmul.mubr.msk.f32.vlgmr.msra.gmra.mrb[4].mxu1 %vm114_vm0, %v1130_v10 }
 0x13e   :  { %779 = vmatpush3.msra.mxu1 %v95_v11  ;;  %780 = vmatprep.mubr.msk.f32.mxu1 %vm1001_vm1, %v1000_v0 }
 0x20c   :  { %v268_v17 = vpop.f32.mrb[2].mxu1 }
 0x20d   :  { %v348_v18 = vmul.f32 %v268_v17, %v100_v15  ;;  %v767_v19 = vpop.f32.mrb[3].mxu1 }
 0x20f   :  { %v351_v21 = vsel %vm350_vm2, %v348_v18, -inf }
 0x210   :  { %352 = vmax.xlane.f32.xlu0 %v351_v21  ;;  %v344_v22 = vpop.f32.mrb[4].mxu1 }
 0x211   :  { %v349_v23 = vmul.f32 %v344_v22, %v101_v20  ;;  %v772_v24 = vpop.f32.mrb[5].mxu1 }
 0x213   :  { %v354_v25 = vsel %vm350_vm2, %v349_v23, -inf }
 0x214   :  { %355 = vmax.xlane.f32.xlu0 %v354_v25 }
 0x29d   :  { %v353_v26 = vpop.xlane.xlu0 %352 }
 0x29e   :  { %v357_v27 = vsub.f32 %v348_v18, %v353_v26 }
 0x2a0   :  { %v359_v28 = vmul.f32 1.442695, %v357_v27 }
 0x2a1   :  { %v356_v29 = vpop.xlane.xlu0 %355 }
 0x2a2   :  { %841 = vpow2.f32 %v359_v28  ;;  %v358_v30 = vsub.f32 %v349_v23, %v356_v29 }
 0x2a4   :  { %v361_v31 = vmul.f32 1.442695, %v358_v30 }
 0x2a6   :  { %843 = vpow2.f32 %v361_v31 }
 0x2ac   :  { %v842_v32 = vpop.eup %841 }
 0x2ad   :  { %v371_v33 = vsel %vm350_vm2, %v842_v32, 0.0  ;;  %v363_v34 = vmul.f32 %v842_v32, %v100_v15 }
 0x2ae   :  { %372 = vadd.xlane.f32.xlu1 %v371_v33 }
 0x2af   :  { %v365_v35 = vsel %vm350_vm2, %v363_v34, 0.0 }
 0x2b0   :  { %v844_v36 = vpop.eup %843  ;;  %366 = vadd.xlane.f32.xlu0 %v365_v35 }
 0x2b1   :  { %v374_v37 = vsel %vm350_vm2, %v844_v36, 0.0  ;;  %v364_v38 = vmul.f32 %v844_v36, %v101_v20 }
 0x2b2   :  { %375 = vadd.xlane.f32.xlu1 %v374_v37 }
 0x2b3   :  { %v368_v39 = vsel %vm350_vm2, %v364_v38, 0.0 }
 0x2b6   :  { %369 = vadd.xlane.f32.xlu1 %v368_v39 }
 0x33b   :  { %v373_v43 = vpop.xlane.xlu1 %372 }
 0x33c   :  { %v377_v44 = vmul.f32 1e-13, %v373_v43 }
 0x33d   :  { %v367_v45 = vpop.xlane.xlu0 %366 }
 0x33e   :  { %v379_v46 = vadd.f32 %v377_v44, %v367_v45 }
 0x33f   :  { %v376_v47 = vpop.xlane.xlu1 %375 }
 0x340   :  { %845 = vrcp.f32 %v379_v46  ;;  %v378_v48 = vmul.f32 1e-13, %v376_v47 }
 0x343   :  { %v370_v49 = vpop.xlane.xlu1 %369 }
 0x344   :  { %v380_v50 = vadd.f32 %v378_v48, %v370_v49 }
 0x346   :  { %847 = vrcp.f32 %v380_v50 }
 0x34a   :  { %v846_v53 = vpop.eup %845 }
 0x34b   :  { %v383_v54 = vmul.f32 %v846_v53, %v363_v34 }
 0x34d   :  { %776 = vmatmul.mubr.msk.f32.vlgmr.msra.gmra.mrb[0].mxu0 %vm350_vm2, %v383_v54 }
 0x34e   :  { %816 = vmatpush3.bf16.msra.mxu0 %v813_v42  ;;  %791 = vmatprep.mubr.msk.f32.mxu0 %vm114_vm0, %v1132_v12 }
 0x34f   :  { %818 = vmatprep.subr.bf16.mxu0 %v817_v55 }
 0x350   :  { %v848_v59 = vpop.eup %847 }
 0x351   :  { %v384_v60 = vmul.f32 %v848_v59, %v364_v38 }
 0x352   :  { %820 = vmatpush3.bf16.msra.mxu0 %v817_v55 }
 0x353   :  { %781 = vmatmul.mubr.msk.f32.vlgmr.msra.gmra.mrb[6].mxu1 %vm350_vm2, %v384_v60  ;;  %822 = vmatprep.subr.bf16.mxu0 %v821_v58 }
 0x355   :  { %792 = vmatmul.mubr.msk.f32.vlgmr.msra.gmra.mrb[2].mxu0 %vm114_vm0, %v1130_v10 }
 0x356   :  { %824 = vmatpush3.bf16.msra.mxu0 %v821_v58 }
 0x357   :  { %826 = vmatprep.subr.bf16.mxu0 %v825_v63 }
 0x35a   :  { %828 = vmatpush3.bf16.msra.mxu0 %v825_v63 }
 0x420   :  { %v454_v0 = vpop.f32.mrb[0].mxu0 }
 0x421   :  { %v777_v1 = vpop.f32.mrb[1].mxu0  ;;  %802 = vmatprep.mubr.msk.f32.mxu0 %vm114_vm0, %v454_v0 }
 0x426   :  { %v527_v2 = vpop.f32.mrb[6].mxu1 }
 0x427   :  { %v782_v3 = vpop.f32.mrb[7].mxu1  ;;  %803 = vmatmul.mubr.msk.f32.vlgmr.msra.gmra.mrb[2].mxu0 %vm114_vm0, %v527_v2 }
 0x4fa   :  { %v804_v4 = vpop.f32.mrb[2].mxu0 }
 0x4fb   :  { %849 = vtanh.f32 %v804_v4  ;;  %v678_v5 = vpop.f32.mrb[3].mxu0 }
 0x4fc   :  { %851 = vtanh.f32 %v678_v5 }
 0x505   :  { %v850_v6 = vpop.eup %849 }
 0x506   :  { %v852_v7 = vpop.eup %851  ;;  %690 = vst.msk [vmem:[#allocation11 + $0x8] sm:$0xff] %vm114_vm0, %v850_v6 }
 0x507   :  { %689 = vst.msk [vmem:[#allocation11] sm:$0xff] %vm114_vm0, %v852_v7 }
 0x508   :  { %974 = shalt.err (!%p971_p2)
}
 0x509   :  { %s975_s14 = scalar_lea.hbm %s1179_s6, 256 }
 0x50a   :  { %p976_p3 = scmp.ne.s32.totalorder %s1179_s6, %s975_s14  ;;  %p979_p4 = scmp.lt.u32.totalorder %s975_s14, %s1179_s6 }
 0x50c   :  { %p981_p5 = pnand %p979_p4, %p976_p3 }
 0x50e   :  { %984 = shalt.err (!%p981_p5)
}
 0x50f   :  { %702 = dma.vmem_to_hbm [thread:$0]  %s697_s4, 256, %s1179_s6, [#allocation4], %s995_s9, %s995_s9, %s996_s10  }
 0x510   :  { %991 = dma.done.wait [#allocation4], 256  }
 0x511   :  { %992 = vsyncadd [#allocation4], 4294967040 }
 0x512   :  { %706 = vsyncpa [#allocation3], 1 }
 0x513   :  { %707 = vsyncpa [#allocation6], 1 }
 0x514   :  { %708 = vsyncpa [#allocation9], 1 }
 0x515   :  { %709 = vsyncpa [#allocation4], 1 }

</bundles_post_ra>
